<compile_context>
chip_gen: v7x
topology: tpu7x:2x2x1
jax: 0.10.0
libtpu: 0.0.40
codegen_flags: <defaults>
</compile_context>

<pallas_src>
import functools

import numpy as np

import jax
import jax.numpy as jnp
from jax import lax
from jax.experimental import pallas as pl
from jax.experimental.pallas import tpu as pltpu


# ---------------------------------------------------------------------------
# Main kernel: planes flattened to (B*C, H*W).
# ---------------------------------------------------------------------------
def _rot_perm_kernel(sreq_ref, mask_ref, x_ref, o_ref):
    """out[:, d] = m * x[:, d] + (1 - m) * x[:, sreq[d]]  (exact MXU gather)."""
    hw = x_ref.shape[-1]
    s = lax.broadcasted_iota(jnp.int32, (hw, 1), 0)
    perm = (s == sreq_ref[...]).astype(jnp.float32)        # (HW, HW) exact 0/1 permutation
    a = x_ref[...].astype(jnp.float32)                     # (c_blk, HW), lane-dense
    r = jnp.dot(a, perm, preferred_element_type=jnp.float32)   # r[:, d] = a[:, sreq[d]]
    m = mask_ref[...]                                      # (c_blk, 1) keep-mask in {0, 1}
    o_ref[...] = (m * a + (1.0 - m) * r).astype(o_ref.dtype)


# ---------------------------------------------------------------------------
# Fallback kernel for large spatial planes: per-plane exchange-matrix matmuls.
# ---------------------------------------------------------------------------
def _rot_plane_kernel(mask_ref, x_ref, o_ref, *, k, c_blk):
    h, w = x_ref.shape[-2], x_ref.shape[-1]

    def _exchange(n):                                      # J[i, j] = (i + j == n - 1)
        r = lax.broadcasted_iota(jnp.int32, (n, n), 0)
        c = lax.broadcasted_iota(jnp.int32, (n, n), 1)
        return (r + c == n - 1).astype(jnp.float32)

    jh = _exchange(h)
    jw = jh if w == h else _exchange(w)
    base = pl.program_id(0) * c_blk
    for c in range(c_blk):                                 # static unroll; c_blk kept small
        a_raw = x_ref[c]
        a = a_raw.astype(jnp.float32)
        if k == 1:        # rot1 = J @ a^T
            r = lax.dot_general(jh, a, (((1,), (1,)), ((), ())),
                                preferred_element_type=jnp.float32)
        elif k == 2:      # rot2 = J_h @ a @ J_w
            r = jnp.dot(jh, jnp.dot(a, jw, preferred_element_type=jnp.float32),
                        preferred_element_type=jnp.float32)
        else:             # rot3 = rot2(rot1(a))
            r1 = lax.dot_general(jh, a, (((1,), (1,)), ((), ())),
                                 preferred_element_type=jnp.float32)
            r = jnp.dot(jh, jnp.dot(r1, jw, preferred_element_type=jnp.float32),
                        preferred_element_type=jnp.float32)
        keep = mask_ref[base + c] != 0                     # per-plane keep-mask (SMEM scalar)
        o_ref[c] = jnp.where(keep, a_raw, r.astype(o_ref.dtype))


def _pick_block(n_planes, plane_bytes, *, target_bytes, multiple=1, max_planes=256):
    """Largest divisor of n_planes whose block fits the VMEM budget, preferring
    >= 2 grid steps.  `multiple` enforces the second-minor tiling rule
    (divisible by 8, or the full extent)."""
    cand = [d for d in range(1, n_planes + 1)
            if n_planes % d == 0 and d <= max_planes
            and d * plane_bytes <= target_bytes
            and (d % multiple == 0 or d == n_planes)]
    if not cand:
        return 1 if multiple == 1 else n_planes
    multi = [d for d in cand if n_planes // d >= 2]        # keep both v7x TCs busy
    return max(multi) if multi else max(cand)


@functools.partial(jax.jit, static_argnames=("k",))
def _rot_blend(x, mask, k):
    """out[b, c] = mask[b] * x[b, c] + (1 - mask[b]) * rot90(x[b, c], k, (H, W))."""
    B, C, H, W = x.shape
    k = int(k) % 4
    if k == 0:
        return x                                  # blend(x, x) == x: skip a full HBM pass
    assert k % 2 == 0 or H == W, "90/270-degree rotation requires square spatial dims"
    # TODO(synk): non-square inputs with odd k change the spatial shape (pure-rotation
    # branch of the original module); not representable as a same-shape kernel here.

    n_planes = B * C
    HW = H * W
    itemsize = x.dtype.itemsize

    if HW * HW * 4 <= (1 << 20):
        # ---------------- lane-dense flattened permutation-matmul path ----------------
        xf = x.reshape(n_planes, HW)
        maskf = jnp.repeat(mask.astype(jnp.float32), C).reshape(n_planes, 1)
        # Source flat-index for every destination flat-index (numpy, trace time).
        sreq = np.rot90(np.arange(HW, dtype=np.int32).reshape(H, W), k)
        sreq = jnp.asarray(np.ascontiguousarray(sreq).reshape(1, HW))
        c_blk = _pick_block(n_planes, HW * itemsize,
                            target_bytes=1 << 20, multiple=8, max_planes=512)
        grid = (n_planes // c_blk,)
        out = pl.pallas_call(
            _rot_perm_kernel,
            out_shape=jax.ShapeDtypeStruct((n_planes, HW), x.dtype),
            grid_spec=pltpu.PrefetchScalarGridSpec(
                num_scalar_prefetch=0,
                grid=grid,
                in_specs=[pl.BlockSpec((1, HW), lambda i: (0, 0)),       # resident perm row
                          pl.BlockSpec((c_blk, 1), lambda i: (i, 0)),    # keep-mask column
                          pl.BlockSpec((c_blk, HW), lambda i: (i, 0))],
                out_specs=pl.BlockSpec((c_blk, HW), lambda i: (i, 0)),
            ),
            compiler_params=pltpu.CompilerParams(
                dimension_semantics=("parallel",)),
        )(sreq, maskf, xf)
        return out.reshape(B, C, H, W)

    # ---------------- fallback for large spatial planes ----------------
    xf = x.reshape(n_planes, H, W)
    maski = jnp.repeat(mask.astype(jnp.int32), C)
    c_blk = _pick_block(n_planes, HW * itemsize,
                        target_bytes=2 << 20, multiple=1, max_planes=16)
    grid = (n_planes // c_blk,)
    kernel = functools.partial(_rot_plane_kernel, k=k, c_blk=c_blk)
    out = pl.pallas_call(
        kernel,
        out_shape=jax.ShapeDtypeStruct((n_planes, H, W), x.dtype),
        grid_spec=pltpu.PrefetchScalarGridSpec(
            num_scalar_prefetch=1,                          # keep-mask -> SMEM
            grid=grid,
            in_specs=[pl.BlockSpec((c_blk, H, W), lambda i, m: (i, 0, 0))],
            out_specs=pl.BlockSpec((c_blk, H, W), lambda i, m: (i, 0, 0)),
        ),
        compiler_params=pltpu.CompilerParams(
            dimension_semantics=("parallel",)),
    )(maski, xf)
    return out.reshape(B, C, H, W)


class Rotation:
    """JAX/Pallas port of the PyTorch Rotation module (forward pass)."""

    def __init__(self, max_range=4):
        self.max_range = max_range
        self.prob = 0.5
        self.last_k = None
        self.last_mask = None

    def __call__(self, x, aug_index=None, key=None):
        B, C = x.shape[0], x.shape[1]
        if aug_index is None:
            # Mirror PyTorch: k drawn on host (np.random.randint) -> no device sync.
            k = int(np.random.randint(4))
            if key is not None:
                mask = jax.random.bernoulli(key, self.prob, (B,)).astype(jnp.int32)
            else:
                mask = jnp.asarray((np.random.rand(B) < self.prob).astype(np.int32))
        else:
            k = int(aug_index) % self.max_range
            mask = jnp.zeros((B,), jnp.int32)     # pure rotation, no blend
        self.last_k, self.last_mask = k, mask
        if k % 4 == 0:
            return x                              # rot0 == identity; blend(x, x) == x
        return _rot_blend(x, mask, k=k)


if __name__ == "__main__":
    np.random.seed(0)
    key = jax.random.PRNGKey(0)
    xkey, x2key, mkey = jax.random.split(key, 3)

    B, C, H, W = 2, 4, 16, 16
    x = jax.random.normal(xkey, (B, C, H, W), dtype=jnp.float32)

    rot = Rotation()

    # Deterministic branch: aug_index given -> pure rot90 (flattened MXU-permutation path).
    for k in range(4):
        out = jax.block_until_ready(rot(x, aug_index=k))
        ref = jnp.rot90(x, k, axes=(2, 3))
        assert out.shape == ref.shape and out.dtype == ref.dtype
        assert jnp.allclose(out, ref, atol=1e-6, rtol=1e-6), f"mismatch k={k}"

    # Explicit blend check (exercises the keep-mask FMA on the flattened path).
    maskb = jnp.array([1, 0], jnp.int32)
    out = jax.block_until_ready(_rot_blend(x, maskb, k=2))
    mf = maskb.astype(jnp.float32).reshape(-1, 1, 1, 1)
    ref = mf * x + (1.0 - mf) * jnp.rot90(x, 2, axes=(2, 3))
    assert jnp.allclose(out, ref, atol=1e-6, rtol=1e-6), "mismatch (blend, flattened path)"

    # Large-plane fallback path (per-plane exchange-matrix matmuls).
    x2 = jax.random.normal(x2key, (1, 2, 24, 24), dtype=jnp.float32)
    for k in (1, 2, 3):
        out = jax.block_until_ready(rot(x2, aug_index=k))
        ref = jnp.rot90(x2, k, axes=(2, 3))
        assert jnp.allclose(out, ref, atol=1e-5, rtol=1e-5), f"mismatch fallback k={k}"
    out = jax.block_until_ready(_rot_blend(x2, jnp.array([1], jnp.int32), k=3))
    assert jnp.allclose(out, x2, atol=1e-6, rtol=1e-6), "mismatch (blend, fallback path)"

    # Stochastic branch: random k + per-batch Bernoulli blend (module API).
    out = jax.block_until_ready(rot(x, aug_index=None, key=mkey))
    mf = rot.last_mask.astype(jnp.float32).reshape(-1, 1, 1, 1)
    ref = mf * x + (1.0 - mf) * jnp.rot90(x, rot.last_k, axes=(2, 3))
    assert jnp.allclose(out, ref, atol=1e-6, rtol=1e-6), "mismatch (stochastic path)"

    print("KERNEL_OK")
</pallas_src>

<mosaic_0001>
module attributes {stable_mosaic.version = 11 : i64} {
  func.func @_rot_perm_kernel(%arg0: i32, %arg1: memref<1x256xi32, #tpu.memory_space<vmem>>, %arg2: memref<8x1xf32, #tpu.memory_space<vmem>>, %arg3: memref<8x256xf32, #tpu.memory_space<vmem>>, %arg4: memref<8x256xf32, #tpu.memory_space<vmem>>) attributes {dimension_semantics = [#tpu.dimension_semantics<parallel>], iteration_bounds = array<i64: 1>, scalar_prefetch = 0 : i64, scratch_operands = 0 : i64, tpu.core_type = #tpu.core_type<tc>, window_params = [{pipeline_mode = #tpu.pipeline_mode<synchronous>, transform_indices = @transform_0, window_bounds = array<i64: 1, 256>}, {transform_indices = @transform_1, window_bounds = array<i64: 8, 1>}, {transform_indices = @transform_2, window_bounds = array<i64: 8, 256>}, {transform_indices = @transform_3, window_bounds = array<i64: 8, 256>}]} {
    %0 = tpu.iota {dimensions = array<i32: 0>} : vector<256x1xi32>
    %c0 = arith.constant 0 : index
    %c0_0 = arith.constant 0 : index
    %1 = vector.load %arg1[%c0, %c0_0] : memref<1x256xi32, #tpu.memory_space<vmem>>, vector<1x256xi32>
    %2 = vector.broadcast %0 : vector<256x1xi32> to vector<256x256xi32>
    %3 = vector.broadcast %1 : vector<1x256xi32> to vector<256x256xi32>
    %4 = arith.cmpi eq, %2, %3 : vector<256x256xi32>
    %5 = arith.extui %4 : vector<256x256xi1> to vector<256x256xi32>
    %6 = arith.sitofp %5 : vector<256x256xi32> to vector<256x256xf32>
    %c0_1 = arith.constant 0 : index
    %c0_2 = arith.constant 0 : index
    %7 = vector.load %arg3[%c0_1, %c0_2] : memref<8x256xf32, #tpu.memory_space<vmem>>, vector<8x256xf32>
    %cst = arith.constant dense<0.000000e+00> : vector<8x256xf32>
    %8 = tpu.matmul %7, %6, %cst {dimension_numbers = #tpu.dot_dimension_numbers<[1], [0], [0], [1], [0, 0, 1, 1], [], []>} : vector<8x256xf32>, vector<256x256xf32>, vector<8x256xf32> -> vector<8x256xf32>
    %c0_3 = arith.constant 0 : index
    %c0_4 = arith.constant 0 : index
    %9 = vector.load %arg2[%c0_3, %c0_4] : memref<8x1xf32, #tpu.memory_space<vmem>>, vector<8x1xf32>
    %10 = vector.broadcast %9 : vector<8x1xf32> to vector<8x256xf32>
    %11 = arith.mulf %10, %7 : vector<8x256xf32>
    %cst_5 = arith.constant 1.000000e+00 : f32
    %12 = vector.broadcast %cst_5 : f32 to vector<8x1xf32>
    %13 = arith.subf %12, %9 : vector<8x1xf32>
    %14 = vector.broadcast %13 : vector<8x1xf32> to vector<8x256xf32>
    %15 = arith.mulf %14, %8 : vector<8x256xf32>
    %16 = arith.addf %11, %15 : vector<8x256xf32>
    %c0_6 = arith.constant 0 : index
    %c0_7 = arith.constant 0 : index
    %17 = vector.load %arg4[%c0_6, %c0_7] : memref<8x256xf32, #tpu.memory_space<vmem>>, vector<8x256xf32>
    tpu.vector_store %arg4[%c0_6, %c0_7], %16 {strides = array<i32>} : memref<8x256xf32, #tpu.memory_space<vmem>>, vector<8x256xf32>,
    return
  }
  func.func @transform_0(%arg0: i32) -> (i32, i32) {
    %c0_i32 = arith.constant 0 : i32
    %c0_i32_0 = arith.constant 0 : i32
    %c0_i32_1 = arith.constant 0 : i32
    return %c0_i32, %c0_i32_0 : i32, i32
  }
  func.func @transform_1(%arg0: i32) -> (i32, i32) {
    %c0_i32 = arith.constant 0 : i32
    %c0_i32_0 = arith.constant 0 : i32
    return %arg0, %c0_i32 : i32, i32
  }
  func.func @transform_2(%arg0: i32) -> (i32, i32) {
    %c0_i32 = arith.constant 0 : i32
    %c0_i32_0 = arith.constant 0 : i32
    return %arg0, %c0_i32 : i32, i32
  }
  func.func @transform_3(%arg0: i32) -> (i32, i32) {
    %c0_i32 = arith.constant 0 : i32
    %c0_i32_0 = arith.constant 0 : i32
    return %arg0, %c0_i32 : i32, i32
  }
}

</mosaic_0001>

<bundles_post_ra>
// kernel: _rot_blend.1
= control target key start
LH: loop header
LB: loop body
LE: loop exit
PB: predicated region body
PF: predicated region fallthrough
CT: control target
= control target key end

     0   :  { %v14_v0 = vlaneseq  ;;  %v540_v2 = vmov 0   ;;  %v541_v16 = vmov 1.0|1.0   ;;  %s721_s0 = inlined_call_operand.vmem [shape: s32[1,256], index: 0, kind: input, shape index: {}]   ;;  %s722_s2 = inlined_call_operand.vmem [shape: f32[8,256], index: 2, kind: input, shape index: {}]   ;;  %s723_s1 = inlined_call_operand.vmem [shape: f32[8,1], index: 1, kind: input, shape index: {}]   ;;  %s724_s3 = inlined_call_operand.vmem [shape: f32[8,256], index: 3, kind: output, shape index: {}]  }
   0x1   :  { %v565_v1 = vld [vmem:[%s722_s2 + $0x8] sm:$0xff]  ;;  %539 = vset.pattern.permute.xlu0 %v540_v2  ;;  %v321_v4 = vld [vmem:[%s723_s1] sm:$0xff] }
   0x2   :  { %v567_v3 = vshrl.u32 %v14_v0, 7  ;;  %314 = vmatprep.mubr.f32.mxu0 %v565_v1  ;;  %v47_v5 = vld [vmem:[%s721_s0] sm:$0x3]  ;;  %324 = vperm.xlu0 %539, %v321_v4   ;;  %v329_v6 = vsub.f32 1.0, %v321_v4 }
   0x3   :  { %v248_v43 = vld [vmem:[%s722_s2] sm:$0xff] }
   0x4   :  { %v16_v7 = vadd.s32 8, %v567_v3  ;;  %v54_v8 = vsub.s32 1, %v567_v3  ;;  %v50_v9 = vsub.s32 0, %v567_v3  ;;  %v17_v10 = vadd.s32 16, %v567_v3 }
   0x5   :  { %v18_v11 = vadd.s32 24, %v567_v3  ;;  %v19_v14 = vadd.s32 32, %v567_v3  ;;  %v20_v15 = vadd.s32 40, %v567_v3  ;;  %v21_v17 = vadd.s32 48, %v567_v3 }
   0x6   :  { %v581_v12 = vrot.slane %v47_v5, %v54_v8  ;;  %v583_v13 = vrot.slane %v47_v5, %v50_v9  ;;  %332 = vperm.xlu0 %539, %v329_v6   ;;  %v22_v18 = vadd.s32 56, %v567_v3  ;;  %v23_v19 = vadd.s32 64, %v567_v3 }
   0x7   :  { %v24_v20 = vadd.s32 72, %v567_v3  ;;  %v25_v21 = vadd.s32 80, %v567_v3  ;;  %v26_v22 = vadd.s32 88, %v567_v3  ;;  %v27_v23 = vadd.s32 96, %v567_v3 }
   0x8   :  { %vm57_vm0 = vcmp.eq.s32.totalorder %v567_v3, %v581_v12  ;;  %vm59_vm1 = vcmp.eq.s32.totalorder %v16_v7, %v581_v12  ;;  %vm56_vm2 = vcmp.eq.s32.totalorder %v567_v3, %v583_v13  ;;  %vm58_vm3 = vcmp.eq.s32.totalorder %v16_v7, %v583_v13 }
   0x9   :  { %vm473_vm4 = vmpackc.low %vm59_vm1, %vm57_vm0  ;;  %vm61_vm5 = vcmp.eq.s32.totalorder %v17_v10, %v581_v12  ;;  %vm63_vm6 = vcmp.eq.s32.totalorder %v18_v11, %v581_v12  ;;  %vm60_vm7 = vcmp.eq.s32.totalorder %v17_v10, %v583_v13  ;;  %vm62_vm8 = vcmp.eq.s32.totalorder %v18_v11, %v583_v13 }
   0xa   :  { %474 = vmatprep.subr.msk.bf16.mxu0 %vm473_vm4, %v541_v16  ;;  %vm475_vm9 = vmpackc.low %vm58_vm3, %vm56_vm2  ;;  %vm65_vm10 = vcmp.eq.s32.totalorder %v19_v14, %v581_v12  ;;  %vm67_vm11 = vcmp.eq.s32.totalorder %v20_v15, %v581_v12  ;;  %vm64_vm15 = vcmp.eq.s32.totalorder %v19_v14, %v583_v13  ;;  %vm66_vm0 = vcmp.eq.s32.totalorder %v20_v15, %v583_v13 }
   0xb   :  { %476 = vmatpush1.bf16.msk.msra.mxu0 %vm475_vm9, %v541_v16  ;;  %vm477_vm12 = vmpackc.low %vm63_vm6, %vm61_vm5  ;;  %vm69_vm1 = vcmp.eq.s32.totalorder %v21_v17, %v581_v12  ;;  %vm71_vm2 = vcmp.eq.s32.totalorder %v22_v18, %v581_v12  ;;  %vm68_vm5 = vcmp.eq.s32.totalorder %v21_v17, %v583_v13  ;;  %vm70_vm6 = vcmp.eq.s32.totalorder %v22_v18, %v583_v13 }
   0xc   :  { %478 = vmatprep.subr.msk.bf16.mxu0 %vm477_vm12, %v541_v16  ;;  %vm479_vm13 = vmpackc.low %vm62_vm8, %vm60_vm7  ;;  %vm73_vm7 = vcmp.eq.s32.totalorder %v23_v19, %v581_v12  ;;  %vm75_vm8 = vcmp.eq.s32.totalorder %v24_v20, %v581_v12  ;;  %vm74_vm12 = vcmp.eq.s32.totalorder %v24_v20, %v583_v13  ;;  %v28_v24 = vadd.s32 104, %v567_v3 }
   0xd   :  { %vm481_vm14 = vmpackc.low %vm67_vm11, %vm65_vm10  ;;  %vm72_vm11 = vcmp.eq.s32.totalorder %v23_v19, %v583_v13  ;;  %v29_v25 = vadd.s32 112, %v567_v3  ;;  %v30_v26 = vadd.s32 120, %v567_v3  ;;  %v31_v27 = vadd.s32 128, %v567_v3 }
   0xe   :  { %vm483_vm3 = vmpackc.low %vm66_vm0, %vm64_vm15  ;;  %v32_v28 = vadd.s32 136, %v567_v3  ;;  %v33_v29 = vadd.s32 144, %v567_v3  ;;  %v34_v30 = vadd.s32 152, %v567_v3  ;;  %v35_v31 = vadd.s32 160, %v567_v3 }
   0xf   :  { %480 = vmatpush1.bf16.msk.msra.mxu0 %vm479_vm13, %v541_v16  ;;  %vm485_vm4 = vmpackc.low %vm71_vm2, %vm69_vm1  ;;  %vm77_vm13 = vcmp.eq.s32.totalorder %v25_v21, %v581_v12  ;;  %vm76_vm1 = vcmp.eq.s32.totalorder %v25_v21, %v583_v13  ;;  %vm78_vm2 = vcmp.eq.s32.totalorder %v26_v22, %v583_v13  ;;  %v36_v32 = vadd.s32 168, %v567_v3 }
  0x10   :  { %482 = vmatprep.subr.msk.bf16.mxu0 %vm481_vm14, %v541_v16  ;;  %vm487_vm9 = vmpackc.low %vm70_vm6, %vm68_vm5  ;;  %vm79_vm14 = vcmp.eq.s32.totalorder %v26_v22, %v581_v12  ;;  %v37_v33 = vadd.s32 176, %v567_v3  ;;  %v38_v34 = vadd.s32 184, %v567_v3  ;;  %v39_v35 = vadd.s32 192, %v567_v3 }
  0x11   :  { %vm489_vm10 = vmpackc.low %vm75_vm8, %vm73_vm7  ;;  %vm80_vm7 = vcmp.eq.s32.totalorder %v27_v23, %v583_v13  ;;  %vm82_vm8 = vcmp.eq.s32.totalorder %v28_v24, %v583_v13  ;;  %v40_v36 = vadd.s32 200, %v567_v3  ;;  %v41_v37 = vadd.s32 208, %v567_v3 }
  0x12   :  { %vm491_vm15 = vmpackc.low %vm74_vm12, %vm72_vm11  ;;  %v42_v38 = vadd.s32 216, %v567_v3  ;;  %v43_v39 = vadd.s32 224, %v567_v3  ;;  %v44_v40 = vadd.s32 232, %v567_v3  ;;  %v45_v41 = vadd.s32 240, %v567_v3 }
  0x13   :  { %484 = vmatpush1.bf16.msk.msra.mxu0 %vm483_vm3, %v541_v16  ;;  %vm493_vm0 = vmpackc.low %vm79_vm14, %vm77_vm13  ;;  %vm81_vm3 = vcmp.eq.s32.totalorder %v27_v23, %v581_v12  ;;  %vm84_vm13 = vcmp.eq.s32.totalorder %v29_v25, %v583_v13  ;;  %vm86_vm14 = vcmp.eq.s32.totalorder %v30_v26, %v583_v13  ;;  %v46_v42 = vadd.s32 248, %v567_v3 }
  0x14   :  { %486 = vmatprep.subr.msk.bf16.mxu0 %vm485_vm4, %v541_v16  ;;  %vm83_vm4 = vcmp.eq.s32.totalorder %v28_v24, %v581_v12  ;;  %vm495_vm5 = vmpackc.low %vm78_vm2, %vm76_vm1 }
  0x15   :  { %vm497_vm6 = vmpackc.low %vm83_vm4, %vm81_vm3  ;;  %vm88_vm3 = vcmp.eq.s32.totalorder %v31_v27, %v583_v13  ;;  %vm90_vm4 = vcmp.eq.s32.totalorder %v32_v28, %v583_v13 }
  0x16   :  { %vm499_vm11 = vmpackc.low %vm82_vm8, %vm80_vm7 }
  0x17   :  { %488 = vmatpush1.bf16.msk.msra.mxu0 %vm487_vm9, %v541_v16  ;;  %vm85_vm9 = vcmp.eq.s32.totalorder %v29_v25, %v581_v12  ;;  %vm503_vm1 = vmpackc.low %vm86_vm14, %vm84_vm13 }
  0x18   :  { %490 = vmatprep.subr.msk.bf16.mxu0 %vm489_vm10, %v541_v16  ;;  %vm87_vm10 = vcmp.eq.s32.totalorder %v30_v26, %v581_v12  ;;  %vm507_vm7 = vmpackc.low %vm90_vm4, %vm88_vm3 }
  0x19   :  { %vm501_vm12 = vmpackc.low %vm87_vm10, %vm85_vm9  ;;  %vm92_vm9 = vcmp.eq.s32.totalorder %v33_v29, %v583_v13  ;;  %vm94_vm10 = vcmp.eq.s32.totalorder %v34_v30, %v583_v13 }
  0x1a   :  { %vm511_vm13 = vmpackc.low %vm94_vm10, %vm92_vm9 }
  0x1b   :  { %492 = vmatpush1.bf16.msk.msra.mxu0 %vm491_vm15, %v541_v16  ;;  %vm89_vm15 = vcmp.eq.s32.totalorder %v31_v27, %v581_v12 }
  0x1c   :  { %494 = vmatprep.subr.msk.bf16.mxu0 %vm493_vm0, %v541_v16  ;;  %vm91_vm0 = vcmp.eq.s32.totalorder %v32_v28, %v581_v12 }
  0x1d   :  { %vm505_vm2 = vmpackc.low %vm91_vm0, %vm89_vm15  ;;  %vm96_vm15 = vcmp.eq.s32.totalorder %v35_v31, %v583_v13  ;;  %vm98_vm0 = vcmp.eq.s32.totalorder %v36_v32, %v583_v13 }
  0x1e   :  { %vm515_vm3 = vmpackc.low %vm98_vm0, %vm96_vm15 }
  0x1f   :  { %496 = vmatpush1.bf16.msk.msra.mxu0 %vm495_vm5, %v541_v16  ;;  %vm93_vm5 = vcmp.eq.s32.totalorder %v33_v29, %v581_v12 }
  0x20   :  { %498 = vmatprep.subr.msk.bf16.mxu0 %vm497_vm6, %v541_v16  ;;  %vm95_vm6 = vcmp.eq.s32.totalorder %v34_v30, %v581_v12 }
  0x21   :  { %vm509_vm8 = vmpackc.low %vm95_vm6, %vm93_vm5  ;;  %vm100_vm5 = vcmp.eq.s32.totalorder %v37_v33, %v583_v13  ;;  %vm102_vm6 = vcmp.eq.s32.totalorder %v38_v34, %v583_v13 }
  0x22   :  { %vm519_vm9 = vmpackc.low %vm102_vm6, %vm100_vm5 }
  0x23   :  { %500 = vmatpush1.bf16.msk.msra.mxu0 %vm499_vm11, %v541_v16  ;;  %vm97_vm11 = vcmp.eq.s32.totalorder %v35_v31, %v581_v12 }
  0x24   :  { %502 = vmatprep.subr.msk.bf16.mxu0 %vm501_vm12, %v541_v16  ;;  %vm99_vm12 = vcmp.eq.s32.totalorder %v36_v32, %v581_v12 }
  0x25   :  { %vm513_vm14 = vmpackc.low %vm99_vm12, %vm97_vm11  ;;  %vm104_vm11 = vcmp.eq.s32.totalorder %v39_v35, %v583_v13  ;;  %vm106_vm12 = vcmp.eq.s32.totalorder %v40_v36, %v583_v13 }
  0x26   :  { %vm523_vm15 = vmpackc.low %vm106_vm12, %vm104_vm11 }
  0x27   :  { %504 = vmatpush1.bf16.msk.msra.mxu0 %vm503_vm1, %v541_v16  ;;  %vm101_vm1 = vcmp.eq.s32.totalorder %v37_v33, %v581_v12 }
  0x28   :  { %506 = vmatprep.subr.msk.bf16.mxu0 %vm505_vm2, %v541_v16  ;;  %vm103_vm2 = vcmp.eq.s32.totalorder %v38_v34, %v581_v12 }
  0x29   :  { %vm517_vm4 = vmpackc.low %vm103_vm2, %vm101_vm1  ;;  %vm108_vm1 = vcmp.eq.s32.totalorder %v41_v37, %v583_v13  ;;  %vm110_vm2 = vcmp.eq.s32.totalorder %v42_v38, %v583_v13 }
  0x2a   :  { %vm527_vm5 = vmpackc.low %vm110_vm2, %vm108_vm1 }
  0x2b   :  { %508 = vmatpush1.bf16.msk.msra.mxu0 %vm507_vm7, %v541_v16  ;;  %vm105_vm7 = vcmp.eq.s32.totalorder %v39_v35, %v581_v12 }
  0x2c   :  { %510 = vmatprep.subr.msk.bf16.mxu0 %vm509_vm8, %v541_v16  ;;  %vm107_vm8 = vcmp.eq.s32.totalorder %v40_v36, %v581_v12 }
  0x2d   :  { %vm521_vm10 = vmpackc.low %vm107_vm8, %vm105_vm7  ;;  %vm112_vm7 = vcmp.eq.s32.totalorder %v43_v39, %v583_v13  ;;  %vm114_vm8 = vcmp.eq.s32.totalorder %v44_v40, %v583_v13 }
  0x2e   :  { %vm531_vm11 = vmpackc.low %vm114_vm8, %vm112_vm7 }
  0x2f   :  { %512 = vmatpush1.bf16.msk.msra.mxu0 %vm511_vm13, %v541_v16  ;;  %vm109_vm13 = vcmp.eq.s32.totalorder %v41_v37, %v581_v12 }
  0x30   :  { %514 = vmatprep.subr.msk.bf16.mxu0 %vm513_vm14, %v541_v16  ;;  %vm111_vm14 = vcmp.eq.s32.totalorder %v42_v38, %v581_v12 }
  0x31   :  { %vm525_vm0 = vmpackc.low %vm111_vm14, %vm109_vm13  ;;  %vm116_vm13 = vcmp.eq.s32.totalorder %v45_v41, %v583_v13  ;;  %vm118_vm14 = vcmp.eq.s32.totalorder %v46_v42, %v583_v13 }
  0x33   :  { %516 = vmatpush1.bf16.msk.msra.mxu0 %vm515_vm3, %v541_v16  ;;  %vm113_vm3 = vcmp.eq.s32.totalorder %v43_v39, %v581_v12 }
  0x34   :  { %518 = vmatprep.subr.msk.bf16.mxu0 %vm517_vm4, %v541_v16  ;;  %vm115_vm4 = vcmp.eq.s32.totalorder %v44_v40, %v581_v12 }
  0x35   :  { %vm529_vm6 = vmpackc.low %vm115_vm4, %vm113_vm3 }
  0x37   :  { %520 = vmatpush1.bf16.msk.msra.mxu0 %vm519_vm9, %v541_v16  ;;  %vm117_vm9 = vcmp.eq.s32.totalorder %v45_v41, %v581_v12 }
  0x38   :  { %522 = vmatprep.subr.msk.bf16.mxu0 %vm521_vm10, %v541_v16  ;;  %vm119_vm10 = vcmp.eq.s32.totalorder %v46_v42, %v581_v12 }
  0x39   :  { %vm533_vm12 = vmpackc.low %vm119_vm10, %vm117_vm9 }
  0x3b   :  { %524 = vmatpush1.bf16.msk.msra.mxu0 %vm523_vm15, %v541_v16  ;;  %vm535_vm15 = vmpackc.low %vm118_vm14, %vm116_vm13 }
  0x3c   :  { %526 = vmatprep.subr.msk.bf16.mxu0 %vm525_vm0, %v541_v16 }
  0x3f   :  { %528 = vmatpush1.bf16.msk.msra.mxu0 %vm527_vm5, %v541_v16 }
  0x40   :  { %530 = vmatprep.subr.msk.bf16.mxu0 %vm529_vm6, %v541_v16 }
  0x43   :  { %532 = vmatpush1.bf16.msk.msra.mxu0 %vm531_vm11, %v541_v16 }
  0x44   :  { %534 = vmatprep.subr.msk.bf16.mxu0 %vm533_vm12, %v541_v16 }
  0x47   :  { %536 = vmatpush1.bf16.msk.msra.mxu0 %vm535_vm15, %v541_v16 }
  0x4a   :  { %315 = vmatmul.mubr.f32.vlgmr.msra.gmra.mrb[0].mxu0 %v248_v43 }
  0x81   :  { %v325_v44 = vpop.permute.xlu0 %324 }
  0x82   :  { %v327_v47 = vmul.f32 %v325_v44, %v248_v43  ;;  %v328_v50 = vmul.f32 %v325_v44, %v565_v1 }
  0x85   :  { %v333_v45 = vpop.permute.xlu0 %332 }
 0x11d   :  { %v316_v46 = vpop.f32.mrb[0].mxu0 }
 0x11e   :  { %v335_v48 = vmul.f32 %v333_v45, %v316_v46  ;;  %v318_v49 = vpop.f32.mrb[1].mxu0 }
 0x11f   :  { %v336_v51 = vmul.f32 %v333_v45, %v318_v49 }
 0x120   :  { %v337_v52 = vadd.f32 %v335_v48, %v327_v47 }
 0x121   :  { %v338_v53 = vadd.f32 %v336_v51, %v328_v50 }
 0x122   :  { %339 = vst [vmem:[%s724_s3] sm:$0xff] %v337_v52 }
 0x123   :  { %340 = vst [vmem:[%s724_s3 + $0x8] sm:$0xff] %v338_v53 }

</bundles_post_ra>
